<compile_context>
chip_gen: v7x
topology: tpu7x:2x2x1
jax: 0.10.0
libtpu: 0.0.40
codegen_flags: <defaults>
</compile_context>

<pallas_src>
from functools import partial, reduce

import jax
import jax.numpy as jnp
from jax.experimental import pallas as pl
from jax.experimental.pallas import tpu as pltpu


# ---------------- dense reference operator (correctness check only) ----------------

def _kron_chain(mats):
    return reduce(jnp.kron, mats)


def projector_op(n_qubit: int, basis: int, index: int) -> jnp.ndarray:
    id1 = jnp.eye(2 ** index, dtype=jnp.float32)
    id2 = jnp.eye(2 ** (n_qubit - index - 1), dtype=jnp.float32)
    proj = (jnp.array([[1.0, 0.0], [0.0, 0.0]], dtype=jnp.float32)
            if basis == 0 else
            jnp.array([[0.0, 0.0], [0.0, 1.0]], dtype=jnp.float32))
    return _kron_chain([id1, proj, id2])


def ry_op(n_qubit: int, index: int, theta: jnp.ndarray) -> jnp.ndarray:
    half = theta / 2.0
    c, s = jnp.cos(half), jnp.sin(half)
    ry = jnp.stack([jnp.stack([c, -s]), jnp.stack([s, c])]).astype(jnp.float32)
    id1 = jnp.eye(2 ** index, dtype=jnp.float32)
    id2 = jnp.eye(2 ** (n_qubit - index - 1), dtype=jnp.float32)
    return _kron_chain([id1, ry, id2])


def cry_operator(n_qubit: int, index, theta: jnp.ndarray) -> jnp.ndarray:
    """Dense M such that CRY.forward((xr, xi)) == (xr @ M, xi @ M). Reference only."""
    p0 = projector_op(n_qubit, basis=0, index=index[0])
    p1 = projector_op(n_qubit, basis=1, index=index[0])
    r = ry_op(n_qubit, index[1], theta)
    return p0 + p1 @ r


# ----------------------------------- Pallas kernel -----------------------------------

def _cry_kernel(a_ref, bp_ref, bm_ref, xr_ref, xi_ref, yr_ref, yi_ref, *, stride, dim):
    # Coefficient rows (built in the wrapper from theta + control/target bits):
    #   a[j]  = cos(t/2) if ctrl(j)==1 else 1
    #   bp[j] = -sin(t/2) if ctrl(j)==1 and targ(j)==1 else 0   (multiplies x[:, j-stride])
    #   bm[j] = +sin(t/2) if ctrl(j)==1 and targ(j)==0 else 0   (multiplies x[:, j+stride])
    shape = xr_ref.shape
    a = jnp.broadcast_to(a_ref[...], shape)    # hoisted once, shared by both applies
    bp = jnp.broadcast_to(bp_ref[...], shape)
    bm = jnp.broadcast_to(bm_ref[...], shape)

    def apply(x_ref, y_ref):
        x = x_ref[...]
        # roll(x, k)[j] = x[j - k]  (selected lanes never cross the circular wrap)
        y_ref[...] = (a * x
                      + bp * pltpu.roll(x, shift=stride, axis=1)         # partner j - stride
                      + bm * pltpu.roll(x, shift=dim - stride, axis=1))  # partner j + stride

    apply(xr_ref, yr_ref)
    apply(xi_ref, yi_ref)


def _round_up(v: int, m: int) -> int:
    return ((v + m - 1) // m) * m


def cry_apply(xr, xi, theta, *, n_qubit: int, index, tm: int | None = None):
    """Apply CRY to a batch of (real, imag) state row-vectors: returns (xr @ M, xi @ M)."""
    B, D = xr.shape
    assert xi.shape == (B, D) and D == 2 ** n_qubit
    ctrl, targ = int(index[0]), int(index[1])
    assert ctrl != targ
    shift_c = n_qubit - ctrl - 1
    shift_t = n_qubit - targ - 1
    stride = 1 << shift_t

    # --- per-column coefficient rows (traced in theta -> parameter stays learnable) ---
    half = jnp.asarray(theta, jnp.float32) / 2.0
    c, s = jnp.cos(half), jnp.sin(half)
    col = jnp.arange(D, dtype=jnp.int32)
    cbit = ((col >> shift_c) & 1) == 1
    tbit = ((col >> shift_t) & 1) == 1
    a_row = jnp.where(cbit, c, jnp.float32(1.0)).astype(jnp.float32)[None, :]
    bp_row = jnp.where(cbit & tbit, -s, jnp.float32(0.0)).astype(jnp.float32)[None, :]
    bm_row = jnp.where(cbit & jnp.logical_not(tbit), s, jnp.float32(0.0)).astype(jnp.float32)[None, :]

    # --- batch tiling ---
    b8 = _round_up(B, 8)
    # Budget for the 8 double-buffered (tm, D) f32 I/O tiles (xr/xi/yr/yi x 2 buffers):
    # conservative enough for v5e's 16 MiB default scoped VMEM and v7x's 64 MiB physical.
    vmem_io_budget = 12 * 1024 * 1024
    max_rows_budget = max(8, (vmem_io_budget // (8 * 4 * D)) // 8 * 8)
    # Keep >= ~8 grid steps (>= 2 per v7x TensorCore) so the batch axis can be sharded
    # across both TCs and DMA/compute overlap is possible.
    rows_for_steps = max(8, _round_up(pl.cdiv(b8, 8), 8))
    if tm is None:
        tm = rows_for_steps
    tm = max(8, (min(tm, b8, max_rows_budget) // 8) * 8)

    Bp = _round_up(B, tm)
    if Bp != B:
        pad = Bp - B
        xr = jnp.pad(xr, ((0, pad), (0, 0)))
        xi = jnp.pad(xi, ((0, pad), (0, 0)))
    grid = (Bp // tm,)

    # Scoped-VMEM limit sized to the actual footprint plus headroom for roll temporaries
    # and Mosaic internal scratch; clamped to fit every generation.
    tile_bytes = tm * D * 4
    footprint = 8 * tile_bytes + 4 * tile_bytes + 6 * D * 4
    vmem_limit = int(min(32 * 1024 * 1024, max(8 * 1024 * 1024, 1.5 * footprint)))

    kernel = partial(_cry_kernel, stride=stride, dim=D)

    coef_spec = pl.BlockSpec((1, D), lambda i: (0, 0))   # constant block -> DMA'd once
    row_spec = pl.BlockSpec((tm, D), lambda i: (i, 0))

    yr, yi = pl.pallas_call(
        kernel,
        out_shape=(jax.ShapeDtypeStruct((Bp, D), xr.dtype),
                   jax.ShapeDtypeStruct((Bp, D), xi.dtype)),
        grid_spec=pltpu.PrefetchScalarGridSpec(
            num_scalar_prefetch=0,
            grid=grid,
            in_specs=[coef_spec, coef_spec, coef_spec, row_spec, row_spec],
            out_specs=[row_spec, row_spec],
        ),
        compiler_params=pltpu.CompilerParams(
            dimension_semantics=("parallel",),      # batch axis shardable across v7x TCs
            vmem_limit_bytes=vmem_limit),
        cost_estimate=pl.CostEstimate(
            flops=10 * Bp * D,                      # 3 mul + 2 add per element, 2 streams
            transcendentals=0,
            bytes_accessed=16 * Bp * D + 12 * D),
    )(a_row, bp_row, bm_row, xr, xi)

    if Bp != B:
        yr = yr[:B]
        yi = yi[:B]
    return yr, yi


# --------------------------------------- main ---------------------------------------

if __name__ == "__main__":
    n_qubit = 7            # D = 2^7 = 128 (lane-aligned)
    index = (0, 1)         # control qubit 0, target qubit 1
    D = 2 ** n_qubit
    B = 128                # batch of state vectors -> grid of 8 tiles of 16 rows

    key = jax.random.PRNGKey(0)
    k1, k2 = jax.random.split(key)
    xr = jax.random.normal(k1, (B, D), dtype=jnp.float32)
    xi = jax.random.normal(k2, (B, D), dtype=jnp.float32)

    # RY's single learnable parameter theta (nonzero so the rotation path is exercised).
    theta = jnp.float32(0.5)

    yr, yi = cry_apply(xr, xi, theta, n_qubit=n_qubit, index=index)
    yr, yi = jax.block_until_ready((yr, yi))

    # Reference: dense operator applied exactly as the PyTorch module does (x @ M).
    m = cry_operator(n_qubit, index, theta)
    ref_r = jnp.matmul(xr, m, precision=jax.lax.Precision.HIGHEST)
    ref_i = jnp.matmul(xi, m, precision=jax.lax.Precision.HIGHEST)
    assert jnp.allclose(yr, ref_r, atol=1e-5, rtol=1e-5)
    assert jnp.allclose(yi, ref_i, atol=1e-5, rtol=1e-5)

    print("KERNEL_OK")
</pallas_src>

<mosaic_0001>
module attributes {stable_mosaic.version = 11 : i64} {
  func.func @_cry_kernel(%arg0: i32, %arg1: memref<1x128xf32, #tpu.memory_space<vmem>>, %arg2: memref<1x128xf32, #tpu.memory_space<vmem>>, %arg3: memref<1x128xf32, #tpu.memory_space<vmem>>, %arg4: memref<16x128xf32, #tpu.memory_space<vmem>>, %arg5: memref<16x128xf32, #tpu.memory_space<vmem>>, %arg6: memref<16x128xf32, #tpu.memory_space<vmem>>, %arg7: memref<16x128xf32, #tpu.memory_space<vmem>>) attributes {dimension_semantics = [#tpu.dimension_semantics<parallel>], iteration_bounds = array<i64: 8>, scalar_prefetch = 0 : i64, scratch_operands = 0 : i64, tpu.core_type = #tpu.core_type<tc>, window_params = [{pipeline_mode = #tpu.pipeline_mode<synchronous>, transform_indices = @transform_0, window_bounds = array<i64: 1, 128>}, {pipeline_mode = #tpu.pipeline_mode<synchronous>, transform_indices = @transform_1, window_bounds = array<i64: 1, 128>}, {pipeline_mode = #tpu.pipeline_mode<synchronous>, transform_indices = @transform_2, window_bounds = array<i64: 1, 128>}, {transform_indices = @transform_3, window_bounds = array<i64: 16, 128>}, {transform_indices = @transform_4, window_bounds = array<i64: 16, 128>}, {transform_indices = @transform_5, window_bounds = array<i64: 16, 128>}, {transform_indices = @transform_6, window_bounds = array<i64: 16, 128>}]} {
    %c0 = arith.constant 0 : index
    %c0_0 = arith.constant 0 : index
    %0 = vector.load %arg1[%c0, %c0_0] : memref<1x128xf32, #tpu.memory_space<vmem>>, vector<1x128xf32>
    %1 = vector.shape_cast %0 : vector<1x128xf32> to vector<1x128xf32>
    %2 = vector.broadcast %1 : vector<1x128xf32> to vector<16x128xf32>
    %c0_1 = arith.constant 0 : index
    %c0_2 = arith.constant 0 : index
    %3 = vector.load %arg2[%c0_1, %c0_2] : memref<1x128xf32, #tpu.memory_space<vmem>>, vector<1x128xf32>
    %4 = vector.shape_cast %3 : vector<1x128xf32> to vector<1x128xf32>
    %5 = vector.broadcast %4 : vector<1x128xf32> to vector<16x128xf32>
    %c0_3 = arith.constant 0 : index
    %c0_4 = arith.constant 0 : index
    %6 = vector.load %arg3[%c0_3, %c0_4] : memref<1x128xf32, #tpu.memory_space<vmem>>, vector<1x128xf32>
    %7 = vector.shape_cast %6 : vector<1x128xf32> to vector<1x128xf32>
    %8 = vector.broadcast %7 : vector<1x128xf32> to vector<16x128xf32>
    %c0_5 = arith.constant 0 : index
    %c0_6 = arith.constant 0 : index
    %9 = vector.load %arg4[%c0_5, %c0_6] : memref<16x128xf32, #tpu.memory_space<vmem>>, vector<16x128xf32>
    %10 = arith.mulf %2, %9 : vector<16x128xf32>
    %c32_i32 = arith.constant 32 : i32
    %11 = tpu.dynamic_rotate %9 by %c32_i32 dim 1 : vector<16x128xf32>, i32 -> vector<16x128xf32>
    %12 = arith.mulf %5, %11 : vector<16x128xf32>
    %13 = arith.addf %10, %12 : vector<16x128xf32>
    %c96_i32 = arith.constant 96 : i32
    %14 = tpu.dynamic_rotate %9 by %c96_i32 dim 1 : vector<16x128xf32>, i32 -> vector<16x128xf32>
    %15 = arith.mulf %8, %14 : vector<16x128xf32>
    %16 = arith.addf %13, %15 : vector<16x128xf32>
    %c0_7 = arith.constant 0 : index
    %c0_8 = arith.constant 0 : index
    %17 = vector.load %arg6[%c0_7, %c0_8] : memref<16x128xf32, #tpu.memory_space<vmem>>, vector<16x128xf32>
    tpu.vector_store %arg6[%c0_7, %c0_8], %16 {strides = array<i32>} : memref<16x128xf32, #tpu.memory_space<vmem>>, vector<16x128xf32>,
    %c0_9 = arith.constant 0 : index
    %c0_10 = arith.constant 0 : index
    %18 = vector.load %arg5[%c0_9, %c0_10] : memref<16x128xf32, #tpu.memory_space<vmem>>, vector<16x128xf32>
    %19 = arith.mulf %2, %18 : vector<16x128xf32>
    %c32_i32_11 = arith.constant 32 : i32
    %20 = tpu.dynamic_rotate %18 by %c32_i32_11 dim 1 : vector<16x128xf32>, i32 -> vector<16x128xf32>
    %21 = arith.mulf %5, %20 : vector<16x128xf32>
    %22 = arith.addf %19, %21 : vector<16x128xf32>
    %c96_i32_12 = arith.constant 96 : i32
    %23 = tpu.dynamic_rotate %18 by %c96_i32_12 dim 1 : vector<16x128xf32>, i32 -> vector<16x128xf32>
    %24 = arith.mulf %8, %23 : vector<16x128xf32>
    %25 = arith.addf %22, %24 : vector<16x128xf32>
    %c0_13 = arith.constant 0 : index
    %c0_14 = arith.constant 0 : index
    %26 = vector.load %arg7[%c0_13, %c0_14] : memref<16x128xf32, #tpu.memory_space<vmem>>, vector<16x128xf32>
    tpu.vector_store %arg7[%c0_13, %c0_14], %25 {strides = array<i32>} : memref<16x128xf32, #tpu.memory_space<vmem>>, vector<16x128xf32>,
    return
  }
  func.func @transform_0(%arg0: i32) -> (i32, i32) {
    %c0_i32 = arith.constant 0 : i32
    %c0_i32_0 = arith.constant 0 : i32
    %c0_i32_1 = arith.constant 0 : i32
    return %c0_i32, %c0_i32_0 : i32, i32
  }
  func.func @transform_1(%arg0: i32) -> (i32, i32) {
    %c0_i32 = arith.constant 0 : i32
    %c0_i32_0 = arith.constant 0 : i32
    %c0_i32_1 = arith.constant 0 : i32
    return %c0_i32, %c0_i32_0 : i32, i32
  }
  func.func @transform_2(%arg0: i32) -> (i32, i32) {
    %c0_i32 = arith.constant 0 : i32
    %c0_i32_0 = arith.constant 0 : i32
    %c0_i32_1 = arith.constant 0 : i32
    return %c0_i32, %c0_i32_0 : i32, i32
  }
  func.func @transform_3(%arg0: i32) -> (i32, i32) {
    %c0_i32 = arith.constant 0 : i32
    %c0_i32_0 = arith.constant 0 : i32
    return %arg0, %c0_i32 : i32, i32
  }
  func.func @transform_4(%arg0: i32) -> (i32, i32) {
    %c0_i32 = arith.constant 0 : i32
    %c0_i32_0 = arith.constant 0 : i32
    return %arg0, %c0_i32 : i32, i32
  }
  func.func @transform_5(%arg0: i32) -> (i32, i32) {
    %c0_i32 = arith.constant 0 : i32
    %c0_i32_0 = arith.constant 0 : i32
    return %arg0, %c0_i32 : i32, i32
  }
  func.func @transform_6(%arg0: i32) -> (i32, i32) {
    %c0_i32 = arith.constant 0 : i32
    %c0_i32_0 = arith.constant 0 : i32
    return %arg0, %c0_i32 : i32, i32
  }
}

</mosaic_0001>

<bundles_post_ra>
// kernel: tpu_custom_call.1
= control target key start
LH: loop header
LB: loop body
LE: loop exit
PB: predicated region body
PF: predicated region fallthrough
CT: control target
= control target key end

     0   :  { %s1220_s0 = inlined_call_operand.hbm [shape: f32[1,128], index: 0, kind: input, shape index: {}]   ;;  %s1221_s1 = inlined_call_operand.vmem [shape: f32[1,128], index: 1, kind: input, shape index: {}]   ;;  %s1222_s2 = inlined_call_operand.vmem [shape: f32[1,128], index: 2, kind: input, shape index: {}]   ;;  %s1223_s3 = inlined_call_operand.hbm [shape: f32[128,128], index: 3, kind: input, shape index: {}]   ;;  %s1224_s4 = inlined_call_operand.hbm [shape: f32[128,128], index: 4, kind: input, shape index: {}]   ;;  %s1225_s5 = inlined_call_operand.hbm [shape: f32[128,128], index: 5, kind: output, shape index: {0}]   ;;  %s1226_s6 = inlined_call_operand.hbm [shape: f32[128,128], index: 6, kind: output, shape index: {1}]  }
   0x1   :  { %1232 = sst [smem:[#allocation15_spill]] %s1220_s0 }
   0x2   :  { %12 = vsyncpa [#allocation3], 0 }
   0x3   :  { %13 = vsyncpa [#allocation6], 0 }
   0x4   :  { %15 = vsyncpa [#allocation6 + $0x1], 0 }
   0x5   :  { %16 = vsyncpa [#allocation4], 0 }
   0x6   :  { %18 = vsyncpa [#allocation4 + $0x1], 0 }
   0x7   :  { %19 = vsyncpa [#allocation10], 0 }
   0x8   :  { %21 = vsyncpa [#allocation10 + $0x1], 0  ;;  %s914_s21 = smov 0   ;;  %s916_s22 = smov 0  }
   0x9   :  { %s918_s23 = smov 0   ;;  %s920_s24 = smov 0  }
   0xa LB: > { %s935_s25 = sadd.s32 1, %s866_s24   ;;  %s97_s26 = sadd.s32 1, %s862_s23  ;;  %s866_s24 = sphi %s920_s24, %s1252_s24   ;;  %s862_s23 = sphi %s918_s23, %s1251_s23   ;;  %s858_s22 = sphi %s916_s22, %s1250_s22   ;;  %s854_s21 = sphi %s914_s21, %s1249_s21  }
   0xb   : > { %s94_s27 = ssub.s32 %s866_s24, %s935_s25  ;;  %p104_p0 = scmp.ne.s32.totalorder %s862_s23, %s858_s22 }
   0xc   : > { %p95_p1 = scmp.eq.s32.totalorder %s94_s27, 0  ;;  %p105_p2 = scmp.eq.s32.totalorder %s866_s24, 0 }
   0xd   : > { %p634_p3 = scmp.lt.s32.totalorder %s866_s24, 8  ;;  %s229_s29 = sand.u32 1, %s866_s24  }
   0xe   : > { %s945_s28 = scalar_select %p95_p1, %s862_s23, %s97_s26  }
   0xf   : > { %p106_p4 = por %p105_p2, %p104_p0  ;;  %s231_s30 = sand.u32 1, %s862_s23  }
  0x10   : > { %s952_s7 = sshll.u32 %s231_s30, 4  ;;  %s599_s8 = sshll.u32 %s866_s24, 8 }
  0x11   : > { %s960_s11 = scalar_lea.hbm %s1223_s3, %s599_s8  ;;  %s233_s12 = scalar_lea.vmem [#allocation5], %s952_s7 }
  0x12   : > { %s240_s13 = sshll.u32 %s233_s12, 4  ;;  %p963_p5 = pnand %p634_p3, %p106_p4  ;;  %s967_s13 = int_to_ptr.vmem [resolvable:$true] %s240_s13 }
  0x13   : > { %s969_s15 = scalar_lea.sflag [#allocation6], %s229_s29  ;;  %s676_s16 = scalar_lea.hbm %s960_s11, 256 }
  0x14   : > { %p677_p6 = scmp.ne.s32.totalorder %s960_s11, %s676_s16  ;;  %p678_p7 = pneg %p963_p5 }
  0x15   : > { %s681_s19 = scalar_lea.hbm %s1223_s3, 2048  ;;  %p682_p10 = scmp.lt.u32.totalorder %s960_s11, %s1223_s3 }
  0x16   : > { %p679_p8 = pnand %p678_p7, %p677_p6  ;;  %p683_p11 = scmp.lt.u32.totalorder %s681_s19, %s676_s16 }
  0x17   : > { %p685_p13 = scmp.lt.u32.totalorder %s676_s16, %s960_s11 }
  0x18   : > { %p680_p9 = pneg %p679_p8  ;;  %p684_p12 = por %p683_p11, %p682_p10 }
  0x1a   : > { %p686_p1 = por %p685_p13, %p684_p12 }
  0x1c   : > { %p687_p2 = pnand %p686_p1, %p680_p9 }
  0x1e   : > { %690 = shalt.err (!%p687_p2)
}
  0x1f   : > { %s691_s27 = scalar_lea.vmem %s967_s13, 256  ;;  %s868_s29 = smov [#allocation5]  }
  0x20   : > { %p692_p3 = scmp.ne.s32.totalorder %s967_s13, %s691_s27  ;;  %s696_s30 = sshll.u32 %s868_s29, 4  ;;  %s697_s30 = int_to_ptr.vmem [resolvable:$false] %s696_s30 }
  0x21   : > { %s698_s9 = scalar_lea.vmem %s697_s30, 512  ;;  %p699_p8 = scmp.lt.s32.totalorder %s967_s13, %s697_s30 }
  0x22   : > { %p694_p4 = pnand %p692_p3, %p678_p7  ;;  %p700_p10 = scmp.lt.s32.totalorder %s698_s9, %s691_s27 }
  0x24   : > { %p695_p6 = pneg %p694_p4  ;;  %p701_p11 = por %p700_p10, %p699_p8 }
  0x26   : > { %p702_p12 = pnand %p701_p11, %p695_p6 }
  0x28   : > { %705 = shalt.err (!%p702_p12)
}
  0x29   : > { %s1227_s10 = smov 128   ;;  %s870_s12 = smov 8  }
  0x2a   : > { %622 = dma.hbm_to_vmem [thread:$0]  (!%p963_p5), %s960_s11, 256, %s967_s13, %s969_s15, %s1227_s10, %s1227_s10, %s870_s12  }
  0x2b   : > { %s254_s16 = scalar_lea.vmem [#allocation7], %s952_s7  ;;  %s1002_s18 = sadd.s32 4294967295, %s866_s24  }
  0x2c   : > { %s261_s17 = sshll.u32 %s254_s16, 4  ;;  %s572_s19 = sadd.s32 4294967294, %s866_s24   ;;  %s1035_s17 = int_to_ptr.vmem [resolvable:$true] %s261_s17 }
  0x2d   : > { %p110_p9 = scmp.ne.s32.totalorder %s858_s22, %s854_s21  ;;  %p1228_p13 = scmp.eq.s32.totalorder %s1002_s18, 0 }
  0x2e   : > { %p160_p1 = scmp.eq.s32.totalorder %s1002_s18, 7  ;;  %p166_p2 = scmp.eq.s32.totalorder %s572_s19, 7 }
  0x2f   : > { %p1011_p3 = por %p1228_p13, %p110_p9  ;;  %p573_p4 = scmp.ge.s32.totalorder %s866_s24, 1 }
  0x30   : > { %p1019_p6 = por %p160_p1, %p104_p0  ;;  %p1023_p8 = por %p166_p2, %p110_p9 }
  0x31   : > { %s1234_s20 = scalar_select %p1011_p3, 1, 0 }
  0x32   : > { %s1235_s7 = scalar_select %p1019_p6, 1, 0 }
  0x33   : > { %s1236_s11 = scalar_select %p1023_p8, 1, 0 }
  0x34   : > { %p199_p10 = scmp.lt.s32.totalorder %s866_s24, 9  ;;  %s1033_s27 = scalar_lea.hbm %s1224_s4, %s599_s8 }
  0x35   : > { %s871_s30 = smov [#allocation2]   ;;  %s706_s16 = scalar_lea.hbm %s1033_s27, 256 }
  0x36   : > { %p1037_p0 = pnand %p573_p4, %p199_p10  ;;  %s1041_s9 = sshll.u32 %s871_s30, 4  ;;  %s213_s9 = int_to_ptr.vmem [resolvable:$true] %s1041_s9 }
  0x37   : > { %p707_p12 = scmp.ne.s32.totalorder %s1033_s27, %s706_s16  ;;  %s711_s13 = scalar_lea.hbm %s1224_s4, 2048 }
  0x38   : > { %s1237_s29 = scalar_select %p1037_p0, 1, 0 }
  0x39   : > { %p709_p9 = pnand %p707_p12, %p678_p7  ;;  %p712_p2 = scmp.lt.u32.totalorder %s1033_s27, %s1224_s4 }
  0x3a   : > { %p713_p4 = scmp.lt.u32.totalorder %s711_s13, %s706_s16  ;;  %p715_p13 = scmp.lt.u32.totalorder %s706_s16, %s1033_s27 }
  0x3b   : > { %p710_p1 = pneg %p709_p9 }
  0x3c   : > { %p714_p10 = por %p713_p4, %p712_p2 }
  0x3e   : > { %p716_p8 = por %p715_p13, %p714_p10 }
  0x40   : > { %p717_p6 = pnand %p716_p8, %p710_p1 }
  0x42   : > { %720 = shalt.err (!%p717_p6)
}
  0x43   : > { %s721_s30 = scalar_lea.vmem %s1035_s17, 256  ;;  %s872_s8 = smov [#allocation7]  }
  0x44   : > { %p722_p12 = scmp.ne.s32.totalorder %s1035_s17, %s721_s30  ;;  %s726_s19 = sshll.u32 %s872_s8, 4  ;;  %s727_s19 = int_to_ptr.vmem [resolvable:$false] %s726_s19 }
  0x45   : > { %s728_s10 = scalar_lea.vmem %s727_s19, 512  ;;  %p729_p3 = scmp.lt.s32.totalorder %s1035_s17, %s727_s19 }
  0x46   : > { %p724_p9 = pnand %p722_p12, %p678_p7  ;;  %p730_p2 = scmp.lt.s32.totalorder %s728_s10, %s721_s30 }
  0x48   : > { %p725_p11 = pneg %p724_p9  ;;  %p731_p4 = por %p730_p2, %p729_p3 }
  0x4a   : > { %p732_p13 = pnand %p731_p4, %p725_p11 }
  0x4c   : > { %735 = shalt.err (!%p732_p13)
}
  0x4d   : > { %s1238_s16 = smov 128   ;;  %p1239_p7 = scmp.eq.s32.totalorder %s1002_s18, 0 }
  0x4e   : > { %625 = dma.hbm_to_vmem [thread:$0]  (!%p963_p5), %s1033_s27, 256, %s1035_s17, %s969_s15, %s1238_s16, %s1238_s16, %s870_s12  }
  0x4f   : > { %p1240_p6 = pneg %p1037_p0  ;;  %s1242_s0 = sld [smem:[#allocation15_spill]] }
  0x51   : > { %p1078_p8 = pnand %p1240_p6, %p1239_p7 }
  0x53   : > { %p738_p11 = pneg %p1078_p8 }
  0x55   : > { %s736_s30 = scalar_lea.hbm %s1242_s0, 16 }
  0x56   : > { %p737_p3 = scmp.ne.s32.totalorder %s1242_s0, %s736_s30  ;;  %p743_p10 = scmp.lt.u32.totalorder %s736_s30, %s1242_s0 }
  0x58   : > { %p739_p5 = pnand %p738_p11, %p737_p3 }
  0x5a   : > { %p740_p1 = pneg %p739_p5 }
  0x5c   : > { %p745_p12 = pnand %p743_p10, %p740_p1 }
  0x5e   : > { %748 = shalt.err (!%p745_p12)
}
  0x5f   : > { %s749_s17 = scalar_lea.vmem %s213_s9, 16  ;;  %s756_s27 = scalar_lea.vmem %s213_s9, 32 }
  0x60   : > { %p750_p9 = scmp.ne.s32.totalorder %s213_s9, %s749_s17  ;;  %p757_p13 = scmp.lt.s32.totalorder %s213_s9, %s213_s9 }
  0x61   : > { %p758_p7 = scmp.lt.s32.totalorder %s756_s27, %s749_s17 }
  0x62   : > { %p752_p2 = pnand %p750_p9, %p738_p11 }
  0x63   : > { %p759_p6 = por %p758_p7, %p757_p13 }
  0x64   : > { %p753_p4 = pneg %p752_p2 }
  0x66   : > { %p760_p0 = pnand %p759_p6, %p753_p4 }
  0x68   : > { %763 = shalt.err (!%p760_p0)
}
  0x69   : > { %618 = dma.hbm_to_vmem [thread:$0]  (!%p1078_p8), %s1242_s0, 16, %s213_s9, [#allocation3]  }
  0x6a   : > { %p1243_p3 = scmp.ne.s32.totalorder %s1237_s29, 0 }
  0x6b   : > { %p1244_p5 = scmp.eq.s32.totalorder (!%p1243_p3), %s1002_s18, 0 }
  0x6c   : > { %273 = sbr.rel (%p1243_p3) target bundleno = 288 (0x120), region = 40 }
  0x73   : > { %837 = dma.done.wait (%p1244_p5), [#allocation3], 16   ;;  %p1245_p11 = pmov %p1244_p5 }
  0x74   : > { %s279_s26 = sand.u32 1, %s1002_s18   ;;  %s1106_s14 = sand.u32 1, %s858_s22  }
  0x75   : > { %839 = vsyncadd (%p1245_p11), [#allocation3], 4294967280  ;;  %s1109_s13 = sshll.u32 %s1106_s14, 4  ;;  %s280_s9 = scalar_lea.sflag [#allocation6], %s279_s26 }
  0x76   : > { %s283_s30 = scalar_lea.vmem [#allocation5], %s1109_s13  ;;  %p1246_p0 = scmp.ne.s32.totalorder %s1234_s20, 0 }
  0x78   : > { %841 = dma.done.wait (%p1246_p0), %s280_s9, 512  }
  0x79   : > { %843 = vsyncadd (%p1246_p0), %s280_s9, 4294966784  ;;  %s292_s29 = scalar_lea.vmem [#allocation7], %s1109_s13  ;;  %v356_v1 = vld [vmem:[%s283_s30] sm:$0xff]  ;;  %s873_s8 = smov 32   ;;  %v357_v3 = vld [vmem:[%s283_s30 + $0x8] sm:$0xff] }
  0x7a   : > { %v378_v0 = vld [vmem:[%s292_s29] sm:$0xff]  ;;  %360 = vrot.lane.b32.xlu0 %v356_v1, %s873_s8  ;;  %v379_v2 = vld [vmem:[%s292_s29 + $0x8] sm:$0xff]  ;;  %s874_s19 = smov 96   ;;  %s323_s12 = scalar_lea.vmem [#allocation8], %s1109_s13 }
  0x7b   : > { %382 = vrot.lane.b32.xlu1 %v378_v0, %s873_s8  ;;  %v588_v6 = vld [vmem:[#allocation2] ss:$0 sm:$0xff]  ;;  %s419_s17 = sshll.u32 %s323_s12, 4  ;;  %s601_s16 = sshll.u32 %s1002_s18, 8  ;;  %s1125_s17 = int_to_ptr.vmem [resolvable:$true] %s419_s17 }
  0x7c   : > { %v589_v7 = vld [vmem:[%s1221_s1] ss:$0 sm:$0xff]  ;;  %v358_v8 = vmul.f32 %v588_v6, %v356_v1  ;;  %v359_v12 = vmul.f32 %v588_v6, %v357_v3  ;;  %v380_v15 = vmul.f32 %v588_v6, %v378_v0  ;;  %v381_v16 = vmul.f32 %v588_v6, %v379_v2  ;;  %s1128_s26 = scalar_lea.vmem [#allocation9], %s1109_s13  ;;  %s401_s13 = scalar_lea.sflag [#allocation4], %s1106_s14 }
  0x7d   : > { %v590_v14 = vld [vmem:[%s1222_s2] ss:$0 sm:$0xff]  ;;  %s435_s9 = sshll.u32 %s1128_s26, 4  ;;  %p1247_p1 = scmp.ne.s32.totalorder %s1235_s7, 0  ;;  %s1138_s9 = int_to_ptr.vmem [resolvable:$true] %s435_s9 }
  0x7e   : > { %362 = vrot.lane.b32.xlu0 %v357_v3, %s873_s8  ;;  %s875_s20 = smov [#allocation8]  }
  0x7f   : > { %384 = vrot.lane.b32.xlu1 %v379_v2, %s873_s8  ;;  %s1136_s8 = scalar_lea.hbm %s1225_s5, %s601_s16  ;;  %s768_s15 = sshll.u32 %s875_s20, 4  ;;  %s769_s15 = int_to_ptr.vmem [resolvable:$false] %s768_s15 }
  0x80   : > { %s770_s27 = scalar_lea.vmem %s769_s15, 512  ;;  %p771_p9 = scmp.lt.s32.totalorder %s1125_s17, %s769_s15 }
  0x82   : > { %368 = vrot.lane.b32.xlu0 %v356_v1, %s874_s19 }
  0x83   : > { %370 = vrot.lane.b32.xlu1 %v357_v3, %s874_s19 }
  0x86   : > { %390 = vrot.lane.b32.xlu0 %v378_v0, %s874_s19 }
  0x87   : > { %392 = vrot.lane.b32.xlu1 %v379_v2, %s874_s19  ;;  %s764_s19 = scalar_lea.vmem %s1125_s17, 256 }
  0x88   : > { %p765_p8 = scmp.ne.s32.totalorder %s1125_s17, %s764_s19  ;;  %p772_p2 = scmp.lt.s32.totalorder %s770_s27, %s764_s19 }
  0x8a   : > { %p766_p10 = pnand %p765_p8, %p1247_p1  ;;  %p773_p4 = por %p772_p2, %p771_p9 }
  0x8c   : > { %p767_p12 = pneg %p766_p10 }
  0x8e   : > { %p774_p13 = pnand %p773_p4, %p767_p12 }
  0xec   : > { %v361_v5 = vpop.permute.xlu0 %360 }
  0xed   : > { %v383_v4 = vpop.permute.xlu1 %382  ;;  %v364_v9 = vmul.f32 %v589_v7, %v361_v5 }
  0xee   : > { %v386_v17 = vmul.f32 %v589_v7, %v383_v4 }
  0xef   : > { %v366_v18 = vadd.f32 %v364_v9, %v358_v8 }
  0xf0   : > { %v363_v11 = vpop.permute.xlu0 %362  ;;  %v388_v29 = vadd.f32 %v386_v17, %v380_v15 }
  0xf1   : > { %v385_v10 = vpop.permute.xlu1 %384  ;;  %v365_v13 = vmul.f32 %v589_v7, %v363_v11 }
  0xf2   : > { %v387_v21 = vmul.f32 %v589_v7, %v385_v10 }
  0xf3   : > { %v367_v22 = vadd.f32 %v365_v13, %v359_v12 }
  0xf4   : > { %v369_v20 = vpop.permute.xlu0 %368  ;;  %v389_v30 = vadd.f32 %v387_v21, %v381_v16 }
  0xf5   : > { %v371_v19 = vpop.permute.xlu1 %370  ;;  %v372_v24 = vmul.f32 %v590_v14, %v369_v20 }
  0xf6   : > { %v373_v23 = vmul.f32 %v590_v14, %v371_v19 }
  0xf7   : > { %v374_v26 = vadd.f32 %v372_v24, %v366_v18 }
  0xf8   : > { %v375_v25 = vadd.f32 %v373_v23, %v367_v22  ;;  %v391_v28 = vpop.permute.xlu0 %390 }
  0xf9   : > { %v393_v27 = vpop.permute.xlu1 %392  ;;  %376 = vst [vmem:[%s323_s12] sm:$0xff] %v374_v26  ;;  %v394_v32 = vmul.f32 %v590_v14, %v391_v28 }
  0xfa   : > { %377 = vst [vmem:[%s323_s12 + $0x8] sm:$0xff] %v375_v25  ;;  %v395_v31 = vmul.f32 %v590_v14, %v393_v27 }
  0xfb   : > { %777 = shalt.err (!%p774_p13)
}
  0xfc   : > { %s778_s12 = scalar_lea.hbm %s1136_s8, 256  ;;  %s782_s29 = scalar_lea.hbm %s1225_s5, 2048 }
  0xfd   : > { %p779_p7 = scmp.ne.s32.totalorder %s1136_s8, %s778_s12  ;;  %p783_p5 = scmp.lt.u32.totalorder %s1136_s8, %s1225_s5 }
  0xfe   : > { %p784_p11 = scmp.lt.u32.totalorder %s782_s29, %s778_s12  ;;  %p786_p8 = scmp.lt.u32.totalorder %s778_s12, %s1136_s8 }
  0xff   : > { %p780_p6 = pnand %p779_p7, %p1247_p1 }
 0x100   : > { %p785_p0 = por %p784_p11, %p783_p5 }
 0x101   : > { %p781_p3 = pneg %p780_p6 }
 0x102   : > { %p787_p10 = por %p786_p8, %p785_p0 }
 0x104   : > { %p788_p12 = pnand %p787_p10, %p781_p3 }
 0x106   : > { %791 = shalt.err (!%p788_p12)
}
 0x107   : > { %s876_s19 = smov 128   ;;  %s877_s27 = smov 8   ;;  %v397_v33 = vadd.f32 %v395_v31, %v389_v30  ;;  %v396_v34 = vadd.f32 %v394_v32, %v388_v29 }
 0x108   : > { %611 = dma.vmem_to_hbm [thread:$0]  (%p1247_p1), %s1125_s17, 256, %s1136_s8, %s401_s13, %s876_s19, %s876_s19, %s877_s27  }
 0x109   : > { %s1172_s30 = scalar_lea.hbm %s1226_s6, %s601_s16  ;;  %399 = vst [vmem:[%s1128_s26 + $0x8] sm:$0xff] %v397_v33  ;;  %398 = vst [vmem:[%s1128_s26] sm:$0xff] %v396_v34  ;;  %s406_s29 = scalar_lea.sflag [#allocation10], %s1106_s14 }
 0x10a   : > { %s792_s20 = scalar_lea.vmem %s1138_s9, 256  ;;  %s878_s15 = smov [#allocation9]  }
 0x10b   : > { %p793_p9 = scmp.ne.s32.totalorder %s1138_s9, %s792_s20  ;;  %s796_s0 = sshll.u32 %s878_s15, 4  ;;  %s797_s0 = int_to_ptr.vmem [resolvable:$false] %s796_s0 }
 0x10c   : > { %s798_s17 = scalar_lea.vmem %s797_s0, 512  ;;  %p799_p13 = scmp.lt.s32.totalorder %s1138_s9, %s797_s0 }
 0x10d   : > { %p794_p2 = pnand %p793_p9, %p1247_p1  ;;  %p800_p7 = scmp.lt.s32.totalorder %s798_s17, %s792_s20 }
 0x10f   : > { %p795_p4 = pneg %p794_p2  ;;  %p801_p6 = por %p800_p7, %p799_p13 }
 0x111   : > { %p802_p3 = pnand %p801_p6, %p795_p4 }
 0x113   : > { %805 = shalt.err (!%p802_p3)
}
 0x114   : > { %s806_s18 = scalar_lea.hbm %s1172_s30, 256  ;;  %s810_s8 = scalar_lea.hbm %s1226_s6, 2048 }
 0x115   : > { %p807_p5 = scmp.ne.s32.totalorder %s1172_s30, %s806_s18  ;;  %p811_p8 = scmp.lt.u32.totalorder %s1172_s30, %s1226_s6 }
 0x116   : > { %p812_p10 = scmp.lt.u32.totalorder %s810_s8, %s806_s18  ;;  %p814_p9 = scmp.lt.u32.totalorder %s806_s18, %s1172_s30 }
 0x117   : > { %p808_p11 = pnand %p807_p5, %p1247_p1 }
 0x118   : > { %p813_p12 = por %p812_p10, %p811_p8 }
 0x119   : > { %p809_p0 = pneg %p808_p11 }
 0x11a   : > { %p815_p2 = por %p814_p9, %p813_p12 }
 0x11c   : > { %p816_p4 = pnand %p815_p2, %p809_p0 }
 0x11e   : > { %819 = shalt.err (!%p816_p4)
}
 0x11f   : > { %612 = dma.vmem_to_hbm [thread:$0]  (%p1247_p1), %s1138_s9, 256, %s1172_s30, %s406_s29, %s876_s19, %s876_s19, %s877_s27  }
 0x120 PF: > { %p636_p13 = scmp.ge.s32.totalorder %s866_s24, 2  ;;  %s450_s12 = sand.u32 1, %s854_s21  }
 0x121   : > { %p1248_p7 = scmp.ne.s32.totalorder %s1236_s11, 0  ;;  %s451_s10 = scalar_lea.sflag [#allocation4], %s450_s12 }
 0x123   : > { %p627_p6 = pnand %p636_p13, %p1248_p7 }
 0x125   : > { %845 = dma.done.wait (!%p627_p6), %s451_s10, 256  }
 0x126   : > { %847 = vsyncadd (!%p627_p6), %s451_s10, 4294967040  ;;  %s460_s7 = scalar_lea.sflag [#allocation10], %s450_s12 }
 0x127   : > { %849 = dma.done.wait (!%p627_p6), %s460_s7, 256  }
 0x128   : > { %851 = vsyncadd (!%p627_p6), %s460_s7, 4294967040  ;;  %p24_p1 = scmp.ge.s32.totalorder %s935_s25, 10   ;;  %s1249_s21 = smov %s858_s22 }
 0x129   : > { %s1250_s22 = smov %s862_s23  ;;  %s1251_s23 = smov %s945_s28 }
 0x12a   : > { %s1252_s24 = smov %s935_s25  ;;  %26 = sbr.rel (!%p24_p1) target bundleno = 10 (0xa), region = 118 }
 0x131   :  { %465 = vsyncpa [#allocation3], 1 }
 0x132   :  { %467 = vsyncpa [#allocation3 + $0x1], 1 }
 0x133   :  { %468 = vsyncpa [#allocation6], 1 }
 0x134   :  { %470 = vsyncpa [#allocation6 + $0x1], 1 }
 0x135   :  { %471 = vsyncpa [#allocation4], 1 }
 0x136   :  { %473 = vsyncpa [#allocation4 + $0x1], 1 }
 0x137   :  { %474 = vsyncpa [#allocation10], 1 }
 0x138   :  { %476 = vsyncpa [#allocation10 + $0x1], 1 }

</bundles_post_ra>
